<compile_context>
chip_gen: v7x
topology: tpu7x:2x2x1
jax: 0.10.0
libtpu: 0.0.40
codegen_flags: <defaults>
</compile_context>

<pallas_src>
import jax
import jax.numpy as jnp
from jax.experimental import pallas as pl
from jax.experimental.pallas import tpu as pltpu


def _round_up(x, m):
    return ((x + m - 1) // m) * m


def _fused_classifier_kernel(img_ref, txt_ref, w_img_ref, w_txt_ref, b_fuse_ref,
                             w_cls_ref, b_cls_ref, out_ref):
    # Cast activations to bf16 in-kernel (avoids a wrapper-side cast pass over HBM);
    # both fusion matmuls accumulate into f32 on the MXU.
    img = img_ref[...].astype(jnp.bfloat16)
    txt = txt_ref[...].astype(jnp.bfloat16)
    fused = (
        jnp.dot(img, w_img_ref[...], preferred_element_type=jnp.float32)
        + jnp.dot(txt, w_txt_ref[...], preferred_element_type=jnp.float32)
        + b_fuse_ref[...]                       # (1, D_fuse_p) broadcasts over rows
    )
    # GELU -> "embeddings".
    # NOTE: torch.nn.GELU defaults to exact erf; tanh approximation used here for a
    # guaranteed Mosaic lowering (EUP tanh), drift ~1e-3.
    emb = jax.nn.gelu(fused)
    # Classifier head: Linear(D_fuse -> num_classes), bf16 MXU operands, f32 accumulate.
    logits = (
        jnp.dot(emb.astype(w_cls_ref.dtype), w_cls_ref[...],
                preferred_element_type=jnp.float32)
        + b_cls_ref[...]
    )
    out_ref[...] = logits.astype(out_ref.dtype)


def prepare_params(params, *, lane=128):
    """Pad + cast the weights ONCE (cache the result across forward calls).

    lane=128 is safe on all generations; use 256 on v6e/v7x for large d_fuse/num_classes
    to better fill the 256-wide MXU (re-check VMEM budget if you do).
    """
    d_img, d_fuse = params["w_img"].shape
    d_txt = params["w_txt"].shape[0]
    num_classes = params["w_cls"].shape[1]
    d_fuse_p = _round_up(d_fuse, lane)
    c_p = _round_up(num_classes, lane)
    return {
        "w_img": jnp.pad(params["w_img"],
                         ((0, 0), (0, d_fuse_p - d_fuse))).astype(jnp.bfloat16),
        "w_txt": jnp.pad(params["w_txt"],
                         ((0, 0), (0, d_fuse_p - d_fuse))).astype(jnp.bfloat16),
        "b_fuse": jnp.pad(params["b_fuse"],
                          ((0, 0), (0, d_fuse_p - d_fuse))).astype(jnp.float32),
        "w_cls": jnp.pad(params["w_cls"], ((0, d_fuse_p - d_fuse),
                                           (0, c_p - num_classes))).astype(jnp.bfloat16),
        "b_cls": jnp.pad(params["b_cls"],
                         ((0, 0), (0, c_p - num_classes))).astype(jnp.float32),
        "dims": (int(d_img), int(d_txt), int(d_fuse), int(num_classes),
                 int(d_fuse_p), int(c_p)),
    }


def multimodal_classifier(img_features, text_features, prepared, *, tb=256,
                          out_dtype=jnp.float32):
    """img_features: [B, d_img], text_features: [B, d_txt] -> logits [B, num_classes]."""
    B, d_img = img_features.shape
    d_txt = text_features.shape[1]
    pd_img, pd_txt, d_fuse, num_classes, d_fuse_p, c_p = prepared["dims"]
    assert d_img == pd_img and d_txt == pd_txt, "feature dims don't match prepared params"

    # ---- batch tiling: multiple-of-16 rows, single step when B is small ----
    tb = max(16, _round_up(min(tb, _round_up(B, 16)), 16))
    b_p = _round_up(B, tb)
    n_tiles = b_p // tb
    if n_tiles > 1 and n_tiles % 2 == 1:
        # Even tile count so dimension_semantics=("parallel",) splits evenly over
        # v7x's 2 TensorCores (no effect on single-TC v5e/v6e).
        n_tiles += 1
        b_p = n_tiles * tb

    img = img_features.astype(jnp.float32)
    txt = text_features.astype(jnp.float32)
    if b_p != B:
        img = jnp.pad(img, ((0, b_p - B), (0, 0)))
        txt = jnp.pad(txt, ((0, b_p - B), (0, 0)))

    # ---- VMEM budget: computed from actual block + intermediate bytes ----
    weight_bytes = ((prepared["w_img"].size + prepared["w_txt"].size
                     + prepared["w_cls"].size) * 2        # bf16, single-buffered
                    + (prepared["b_fuse"].size + prepared["b_cls"].size) * 4)
    act_bytes = 2 * tb * (d_img + d_txt) * 4               # f32 input tiles, double-buffered
    out_bytes = 2 * tb * c_p * jnp.dtype(out_dtype).itemsize   # output tiles, double-buffered
    tmp_bytes = (tb * d_fuse_p * (4 + 2)                   # fused f32 + emb bf16
                 + tb * (d_img + d_txt) * 2)               # in-kernel bf16 casts
    need = weight_bytes + act_bytes + out_bytes + tmp_bytes
    vmem_limit = int(min(max(need * 1.25 + (1 << 20), 16 << 20), 96 << 20))

    flops = 2 * b_p * (d_img + d_txt) * d_fuse_p + 2 * b_p * d_fuse_p * c_p
    bytes_accessed = (b_p * (d_img + d_txt) * 4 + weight_bytes
                      + b_p * c_p * jnp.dtype(out_dtype).itemsize)

    out_padded = pl.pallas_call(
        _fused_classifier_kernel,
        out_shape=jax.ShapeDtypeStruct((b_p, c_p), out_dtype),
        grid=(n_tiles,),
        in_specs=[
            # Activation tiles march over the batch (pipelined / double-buffered).
            pl.BlockSpec((tb, d_img), lambda i: (i, 0)),
            pl.BlockSpec((tb, d_txt), lambda i: (i, 0)),
            # Constant weight/bias blocks: fetched once, single-buffered (no 2x VMEM).
            pl.BlockSpec((d_img, d_fuse_p), lambda i: (0, 0), pipeline_mode=pl.Buffered(1)),
            pl.BlockSpec((d_txt, d_fuse_p), lambda i: (0, 0), pipeline_mode=pl.Buffered(1)),
            pl.BlockSpec((1, d_fuse_p), lambda i: (0, 0), pipeline_mode=pl.Buffered(1)),
            pl.BlockSpec((d_fuse_p, c_p), lambda i: (0, 0), pipeline_mode=pl.Buffered(1)),
            pl.BlockSpec((1, c_p), lambda i: (0, 0), pipeline_mode=pl.Buffered(1)),
        ],
        out_specs=pl.BlockSpec((tb, c_p), lambda i: (i, 0)),
        compiler_params=pltpu.CompilerParams(
            dimension_semantics=("parallel",),     # shard batch tiles across TCs (v7x)
            vmem_limit_bytes=vmem_limit,
        ),
        cost_estimate=pl.CostEstimate(
            flops=int(flops),
            transcendentals=int(b_p * d_fuse_p),   # GELU tanh/exp
            bytes_accessed=int(bytes_accessed),
        ),
    )(img, txt, prepared["w_img"], prepared["w_txt"], prepared["b_fuse"],
      prepared["w_cls"], prepared["b_cls"])

    # Drop the zero-padded rows/columns.
    return out_padded[:B, :num_classes]


def init_params(key, d_img, d_txt, d_fuse, num_classes):
    k1, k2, k3, k4 = jax.random.split(key, 4)
    scale_f = 1.0 / jnp.sqrt(d_img + d_txt)
    scale_c = 1.0 / jnp.sqrt(d_fuse)
    return {
        # fusion_model weights: Linear(d_img + d_txt -> d_fuse), split per modality
        "w_img": jax.random.normal(k1, (d_img, d_fuse), jnp.float32) * scale_f,
        "w_txt": jax.random.normal(k2, (d_txt, d_fuse), jnp.float32) * scale_f,
        "b_fuse": jnp.zeros((1, d_fuse), jnp.float32),
        # classifier: Linear(d_fuse -> num_classes)
        "w_cls": jax.random.normal(k3, (d_fuse, num_classes), jnp.float32) * scale_c,
        "b_cls": jax.random.normal(k4, (1, num_classes), jnp.float32) * 0.01,
    }


def reference(img, txt, p):
    # Pure f32 reference of the same forward pass.
    emb = jax.nn.gelu(img @ p["w_img"] + txt @ p["w_txt"] + p["b_fuse"])
    return emb @ p["w_cls"] + p["b_cls"]


if __name__ == "__main__":
    B, D_IMG, D_TXT, D_FUSE, NUM_CLASSES = 40, 32, 32, 32, 10

    key = jax.random.PRNGKey(0)
    k_img, k_txt, k_param = jax.random.split(key, 3)

    img_features = jax.random.normal(k_img, (B, D_IMG), jnp.float32)
    text_features = jax.random.normal(k_txt, (B, D_TXT), jnp.float32)
    params = init_params(k_param, D_IMG, D_TXT, D_FUSE, NUM_CLASSES)

    # Pad/cast the weights once (cache across forward calls in real inference).
    prepared = prepare_params(params)

    # Default tb=256 -> B=40 is padded to a single 48-row tile: grid=(1,), no tail steps.
    logits = multimodal_classifier(img_features, text_features, prepared)
    logits = jax.block_until_ready(logits)

    ref = reference(img_features, text_features, params)
    assert logits.shape == (B, NUM_CLASSES)
    # bf16 matmul operands (f32 accumulation) -> small quantization drift vs f32 reference.
    assert jnp.allclose(logits, ref, atol=3e-2, rtol=3e-2), (
        float(jnp.max(jnp.abs(logits - ref))))

    print("KERNEL_OK")
</pallas_src>

<mosaic_0001>
module attributes {stable_mosaic.version = 11 : i64} {
  func.func @_fused_classifier_kernel(%arg0: i32, %arg1: memref<48x32xf32, #tpu.memory_space<vmem>>, %arg2: memref<48x32xf32, #tpu.memory_space<vmem>>, %arg3: memref<32x128xbf16, #tpu.memory_space<vmem>>, %arg4: memref<32x128xbf16, #tpu.memory_space<vmem>>, %arg5: memref<1x128xf32, #tpu.memory_space<vmem>>, %arg6: memref<128x128xbf16, #tpu.memory_space<vmem>>, %arg7: memref<1x128xf32, #tpu.memory_space<vmem>>, %arg8: memref<48x128xf32, #tpu.memory_space<vmem>>) attributes {dimension_semantics = [#tpu.dimension_semantics<parallel>], iteration_bounds = array<i64: 1>, scalar_prefetch = 0 : i64, scratch_operands = 0 : i64, tpu.core_type = #tpu.core_type<tc>, window_params = [{transform_indices = @transform_0, window_bounds = array<i64: 48, 32>}, {transform_indices = @transform_1, window_bounds = array<i64: 48, 32>}, {pipeline_mode = #tpu.pipeline_mode<synchronous>, transform_indices = @transform_2, window_bounds = array<i64: 32, 128>}, {pipeline_mode = #tpu.pipeline_mode<synchronous>, transform_indices = @transform_3, window_bounds = array<i64: 32, 128>}, {pipeline_mode = #tpu.pipeline_mode<synchronous>, transform_indices = @transform_4, window_bounds = array<i64: 1, 128>}, {pipeline_mode = #tpu.pipeline_mode<synchronous>, transform_indices = @transform_5, window_bounds = array<i64: 128, 128>}, {pipeline_mode = #tpu.pipeline_mode<synchronous>, transform_indices = @transform_6, window_bounds = array<i64: 1, 128>}, {transform_indices = @transform_7, window_bounds = array<i64: 48, 128>}]} {
    %c0 = arith.constant 0 : index
    %c0_0 = arith.constant 0 : index
    %0 = vector.load %arg1[%c0, %c0_0] : memref<48x32xf32, #tpu.memory_space<vmem>>, vector<48x32xf32>
    %1 = arith.truncf %0 : vector<48x32xf32> to vector<48x32xbf16>
    %c0_1 = arith.constant 0 : index
    %c0_2 = arith.constant 0 : index
    %2 = vector.load %arg2[%c0_1, %c0_2] : memref<48x32xf32, #tpu.memory_space<vmem>>, vector<48x32xf32>
    %3 = arith.truncf %2 : vector<48x32xf32> to vector<48x32xbf16>
    %c0_3 = arith.constant 0 : index
    %c0_4 = arith.constant 0 : index
    %4 = vector.load %arg3[%c0_3, %c0_4] : memref<32x128xbf16, #tpu.memory_space<vmem>>, vector<32x128xbf16>
    %cst = arith.constant dense<0.000000e+00> : vector<48x128xf32>
    %5 = tpu.matmul %1, %4, %cst {dimension_numbers = #tpu.dot_dimension_numbers<[1], [0], [0], [1], [0, 0, 1, 1], [], []>} : vector<48x32xbf16>, vector<32x128xbf16>, vector<48x128xf32> -> vector<48x128xf32>
    %c0_5 = arith.constant 0 : index
    %c0_6 = arith.constant 0 : index
    %6 = vector.load %arg4[%c0_5, %c0_6] : memref<32x128xbf16, #tpu.memory_space<vmem>>, vector<32x128xbf16>
    %cst_7 = arith.constant dense<0.000000e+00> : vector<48x128xf32>
    %7 = tpu.matmul %3, %6, %cst_7 {dimension_numbers = #tpu.dot_dimension_numbers<[1], [0], [0], [1], [0, 0, 1, 1], [], []>} : vector<48x32xbf16>, vector<32x128xbf16>, vector<48x128xf32> -> vector<48x128xf32>
    %8 = arith.addf %5, %7 : vector<48x128xf32>
    %c0_8 = arith.constant 0 : index
    %c0_9 = arith.constant 0 : index
    %9 = vector.load %arg5[%c0_8, %c0_9] : memref<1x128xf32, #tpu.memory_space<vmem>>, vector<1x128xf32>
    %10 = vector.broadcast %9 : vector<1x128xf32> to vector<48x128xf32>
    %11 = arith.addf %8, %10 : vector<48x128xf32>
    %12 = arith.mulf %11, %11 : vector<48x128xf32>
    %13 = arith.mulf %11, %12 : vector<48x128xf32>
    %cst_10 = arith.constant 4.471500e-02 : f32
    %14 = vector.broadcast %cst_10 : f32 to vector<48x128xf32>
    %15 = arith.mulf %14, %13 : vector<48x128xf32>
    %16 = arith.addf %11, %15 : vector<48x128xf32>
    %cst_11 = arith.constant 0.797884583 : f32
    %17 = vector.broadcast %cst_11 : f32 to vector<48x128xf32>
    %18 = arith.mulf %17, %16 : vector<48x128xf32>
    %19 = math.tanh %18 : vector<48x128xf32>
    %cst_12 = arith.constant 1.000000e+00 : f32
    %20 = vector.broadcast %cst_12 : f32 to vector<48x128xf32>
    %21 = arith.addf %20, %19 : vector<48x128xf32>
    %cst_13 = arith.constant 5.000000e-01 : f32
    %22 = vector.broadcast %cst_13 : f32 to vector<48x128xf32>
    %23 = arith.mulf %22, %21 : vector<48x128xf32>
    %24 = arith.mulf %11, %23 : vector<48x128xf32>
    %25 = arith.truncf %24 : vector<48x128xf32> to vector<48x128xbf16>
    %c0_14 = arith.constant 0 : index
    %c0_15 = arith.constant 0 : index
    %26 = vector.load %arg6[%c0_14, %c0_15] : memref<128x128xbf16, #tpu.memory_space<vmem>>, vector<128x128xbf16>
    %cst_16 = arith.constant dense<0.000000e+00> : vector<48x128xf32>
    %27 = tpu.matmul %25, %26, %cst_16 {dimension_numbers = #tpu.dot_dimension_numbers<[1], [0], [0], [1], [0, 0, 1, 1], [], []>} : vector<48x128xbf16>, vector<128x128xbf16>, vector<48x128xf32> -> vector<48x128xf32>
    %c0_17 = arith.constant 0 : index
    %c0_18 = arith.constant 0 : index
    %28 = vector.load %arg7[%c0_17, %c0_18] : memref<1x128xf32, #tpu.memory_space<vmem>>, vector<1x128xf32>
    %29 = vector.broadcast %28 : vector<1x128xf32> to vector<48x128xf32>
    %30 = arith.addf %27, %29 : vector<48x128xf32>
    %c0_19 = arith.constant 0 : index
    %c0_20 = arith.constant 0 : index
    %31 = vector.load %arg8[%c0_19, %c0_20] : memref<48x128xf32, #tpu.memory_space<vmem>>, vector<48x128xf32>
    tpu.vector_store %arg8[%c0_19, %c0_20], %30 {strides = array<i32>} : memref<48x128xf32, #tpu.memory_space<vmem>>, vector<48x128xf32>,
    return
  }
  func.func @transform_0(%arg0: i32) -> (i32, i32) {
    %c0_i32 = arith.constant 0 : i32
    %c0_i32_0 = arith.constant 0 : i32
    return %arg0, %c0_i32 : i32, i32
  }
  func.func @transform_1(%arg0: i32) -> (i32, i32) {
    %c0_i32 = arith.constant 0 : i32
    %c0_i32_0 = arith.constant 0 : i32
    return %arg0, %c0_i32 : i32, i32
  }
  func.func @transform_2(%arg0: i32) -> (i32, i32) {
    %c0_i32 = arith.constant 0 : i32
    %c0_i32_0 = arith.constant 0 : i32
    %c0_i32_1 = arith.constant 0 : i32
    return %c0_i32, %c0_i32_0 : i32, i32
  }
  func.func @transform_3(%arg0: i32) -> (i32, i32) {
    %c0_i32 = arith.constant 0 : i32
    %c0_i32_0 = arith.constant 0 : i32
    %c0_i32_1 = arith.constant 0 : i32
    return %c0_i32, %c0_i32_0 : i32, i32
  }
  func.func @transform_4(%arg0: i32) -> (i32, i32) {
    %c0_i32 = arith.constant 0 : i32
    %c0_i32_0 = arith.constant 0 : i32
    %c0_i32_1 = arith.constant 0 : i32
    return %c0_i32, %c0_i32_0 : i32, i32
  }
  func.func @transform_5(%arg0: i32) -> (i32, i32) {
    %c0_i32 = arith.constant 0 : i32
    %c0_i32_0 = arith.constant 0 : i32
    %c0_i32_1 = arith.constant 0 : i32
    return %c0_i32, %c0_i32_0 : i32, i32
  }
  func.func @transform_6(%arg0: i32) -> (i32, i32) {
    %c0_i32 = arith.constant 0 : i32
    %c0_i32_0 = arith.constant 0 : i32
    %c0_i32_1 = arith.constant 0 : i32
    return %c0_i32, %c0_i32_0 : i32, i32
  }
  func.func @transform_7(%arg0: i32) -> (i32, i32) {
    %c0_i32 = arith.constant 0 : i32
    %c0_i32_0 = arith.constant 0 : i32
    return %arg0, %c0_i32 : i32, i32
  }
}

</mosaic_0001>

<bundles_post_ra>
// kernel: tpu_custom_call.1
= control target key start
LH: loop header
LB: loop body
LE: loop exit
PB: predicated region body
PF: predicated region fallthrough
CT: control target
= control target key end

     0   :  { %v585_v1 = vmov 0.0   ;;  %vm586_vm0 = vmmov 0   ;;  %vm66_vm1 = vcmask 261120   ;;  %s756_s0 = inlined_call_operand.vmem [shape: f32[48,32], index: 0, kind: input, shape index: {}]   ;;  %s757_s1 = inlined_call_operand.vmem [shape: f32[48,32], index: 1, kind: input, shape index: {}]   ;;  %s758_s2 = inlined_call_operand.vmem [shape: bf16[32,128], index: 2, kind: input, shape index: {}]   ;;  %s759_s3 = inlined_call_operand.vmem [shape: bf16[32,128], index: 3, kind: input, shape index: {}]   ;;  %s760_s4 = inlined_call_operand.vmem [shape: f32[1,128], index: 4, kind: input, shape index: {}]   ;;  %s761_s5 = inlined_call_operand.vmem [shape: bf16[128,128], index: 5, kind: input, shape index: {}]   ;;  %s762_s6 = inlined_call_operand.vmem [shape: f32[1,128], index: 6, kind: input, shape index: {}]   ;;  %s763_s7 = inlined_call_operand.hbm [shape: f32[48,128], index: 7, kind: output, shape index: {}]  }
   0x1   :  { %v537_v0 = vld [vmem:[%s759_s3] sm:$0xff]   ;;  %472 = vmatprep.subr.bf16.mxu1 %v585_v1  ;;  %v538_v2 = vld [vmem:[%s759_s3 + $0x8] sm:$0xff]   ;;  %504 = vmatprep.subr.bf16.mxu0 %v585_v1  ;;  %v39_v7 = vld [vmem:[%s757_s1 + $0x10] sm:$0xff] }
   0x2   :  { %473 = vmatpush3.bf16.msra.mxu1 %v537_v0  ;;  %476 = vmatprep.mubr.msk.bf16.mxu1 %vm586_vm0, %v585_v1  ;;  %v37_v3 = vld [vmem:[%s757_s1] sm:$0xff]  ;;  %v38_v4 = vld [vmem:[%s757_s1 + $0x8] sm:$0xff]  ;;  %v40_v8 = vld [vmem:[%s757_s1 + $0x18] sm:$0xff] }
   0x3   :  { %474 = vmatprep.subr.bf16.mxu1 %v585_v1  ;;  %520 = vmatprep.mubr.msk.bf16.mxu0 %vm586_vm0, %v585_v1  ;;  %v43_v5 = vpack.c.bf16 %v38_v4, %v37_v3  ;;  %v539_v6 = vld [vmem:[%s758_s2] sm:$0xff]   ;;  %v540_v9 = vld [vmem:[%s758_s2 + $0x8] sm:$0xff]   ;;  %v44_v10 = vpack.c.bf16 %v40_v8, %v39_v7 }
   0x6   :  { %475 = vmatpush3.bf16.msra.mxu1 %v538_v2 }
   0x7   :  { %488 = vmatprep.subr.bf16.mxu1 %v585_v1 }
   0x9   :  { %477 = vmatmul.mubr.msk.bf16.vlgmr.msra.gmra.mrb[0].mxu1 %vm66_vm1, %v43_v5 }
   0xa   :  { %489 = vmatpush3.bf16.msra.mxu1 %v539_v6  ;;  %480 = vmatprep.mubr.msk.bf16.mxu1 %vm586_vm0, %v585_v1 }
   0xb   :  { %490 = vmatprep.subr.bf16.mxu1 %v585_v1 }
   0xc   :  { %12 = vsyncpa [#allocation3], 0  ;;  %v41_v11 = vld [vmem:[%s757_s1 + $0x20] sm:$0xff]  ;;  %v42_v12 = vld [vmem:[%s757_s1 + $0x28] sm:$0xff]  ;;  %s587_s22 = smov [#allocation2]  }
   0xd   :  { %v45_v13 = vpack.c.bf16 %v42_v12, %v41_v11  ;;  %v28_v14 = vld [vmem:[%s756_s0] sm:$0xff]  ;;  %v29_v15 = vld [vmem:[%s756_s0 + $0x8] sm:$0xff]  ;;  %v30_v17 = vld [vmem:[%s756_s0 + $0x10] sm:$0xff]  ;;  %s420_s1 = sshll.u32 %s587_s22, 4  ;;  %s421_s1 = int_to_ptr.vmem [resolvable:$true] %s420_s1 }
   0xe   :  { %491 = vmatpush3.bf16.msra.mxu1 %v540_v9  ;;  %v34_v16 = vpack.c.bf16 %v29_v15, %v28_v14  ;;  %v31_v18 = vld [vmem:[%s756_s0 + $0x18] sm:$0xff]  ;;  %v32_v20 = vld [vmem:[%s756_s0 + $0x20] sm:$0xff]  ;;  %v33_v21 = vld [vmem:[%s756_s0 + $0x28] sm:$0xff]  ;;  %p566_p1 = scmp.lt.s32.totalorder %s421_s1, %s421_s1 }
   0xf   :  { %v35_v19 = vpack.c.bf16 %v31_v18, %v30_v17  ;;  %v36_v22 = vpack.c.bf16 %v33_v21, %v32_v20  ;;  %v541_v23 = vld [vmem:[%s761_s5] sm:$0xff]   ;;  %v542_v24 = vld [vmem:[%s761_s5 + $0x8] sm:$0xff]   ;;  %v543_v25 = vld [vmem:[%s761_s5 + $0x10] sm:$0xff]  }
  0x10   :  { %505 = vmatpush3.bf16.msra.mxu0 %v541_v23  ;;  %v544_v26 = vld [vmem:[%s761_s5 + $0x18] sm:$0xff]   ;;  %v545_v27 = vld [vmem:[%s761_s5 + $0x20] sm:$0xff]   ;;  %v546_v28 = vld [vmem:[%s761_s5 + $0x28] sm:$0xff]  }
  0x11   :  { %481 = vmatmul.mubr.msk.bf16.gmra.mrb[4].mxu1 %vm66_vm1, %v44_v10  ;;  %506 = vmatprep.subr.bf16.mxu0 %v585_v1  ;;  %v547_v29 = vld [vmem:[%s761_s5 + $0x30] sm:$0xff]   ;;  %v548_v30 = vld [vmem:[%s761_s5 + $0x38] sm:$0xff]   ;;  %v441_v44 = vld [vmem:[%s760_s4] ss:$0 sm:$0xff] }
  0x12   :  { %484 = vmatprep.mubr.msk.bf16.mxu1 %vm586_vm0, %v585_v1 }
  0x14   :  { %507 = vmatpush3.bf16.msra.mxu0 %v542_v24 }
  0x15   :  { %508 = vmatprep.subr.bf16.mxu0 %v585_v1 }
  0x18   :  { %509 = vmatpush3.bf16.msra.mxu0 %v543_v25 }
  0x19   :  { %485 = vmatmul.mubr.msk.bf16.gmra.mrb[8].mxu1 %vm66_vm1, %v45_v13  ;;  %510 = vmatprep.subr.bf16.mxu0 %v585_v1 }
  0x1a   :  { %492 = vmatprep.mubr.msk.bf16.mxu1 %vm586_vm0, %v585_v1 }
  0x1c   :  { %511 = vmatpush3.bf16.msra.mxu0 %v544_v26 }
  0x1d   :  { %512 = vmatprep.subr.bf16.mxu0 %v585_v1 }
  0x20   :  { %513 = vmatpush3.bf16.msra.mxu0 %v545_v27 }
  0x21   :  { %493 = vmatmul.mubr.msk.bf16.vlgmr.msra.gmra.mrb[12].mxu1 %vm66_vm1, %v34_v16  ;;  %514 = vmatprep.subr.bf16.mxu0 %v585_v1 }
  0x22   :  { %496 = vmatprep.mubr.msk.bf16.mxu1 %vm586_vm0, %v585_v1 }
  0x24   :  { %515 = vmatpush3.bf16.msra.mxu0 %v546_v28 }
  0x25   :  { %516 = vmatprep.subr.bf16.mxu0 %v585_v1 }
  0x28   :  { %517 = vmatpush3.bf16.msra.mxu0 %v547_v29 }
  0x29   :  { %497 = vmatmul.mubr.msk.bf16.gmra.mrb[16].mxu1 %vm66_vm1, %v35_v19  ;;  %518 = vmatprep.subr.bf16.mxu0 %v585_v1 }
  0x2a   :  { %500 = vmatprep.mubr.msk.bf16.mxu1 %vm586_vm0, %v585_v1 }
  0x2c   :  { %519 = vmatpush3.bf16.msra.mxu0 %v548_v30 }
  0x31   :  { %501 = vmatmul.mubr.msk.bf16.gmra.mrb[20].mxu1 %vm66_vm1, %v36_v22 }
  0xdc   :  { %v110_v31 = vpop.f32.mrb[0].mxu1 }
  0xdd   :  { %v478_v32 = vpop.f32.mrb[1].mxu1 }
  0xde   :  { %v113_v33 = vpop.f32.mrb[2].mxu1 }
  0xdf   :  { %v479_v34 = vpop.f32.mrb[3].mxu1 }
  0xe4   :  { %v118_v35 = vpop.f32.mrb[4].mxu1 }
  0xe5   :  { %v482_v36 = vpop.f32.mrb[5].mxu1 }
  0xe6   :  { %v121_v37 = vpop.f32.mrb[6].mxu1 }
  0xe7   :  { %v483_v38 = vpop.f32.mrb[7].mxu1 }
  0xec   :  { %v126_v39 = vpop.f32.mrb[8].mxu1 }
  0xed   :  { %v486_v40 = vpop.f32.mrb[9].mxu1 }
  0xee   :  { %v129_v41 = vpop.f32.mrb[10].mxu1 }
  0xef   :  { %v487_v42 = vpop.f32.mrb[11].mxu1 }
  0xf4   :  { %v188_v43 = vpop.f32.mrb[12].mxu1 }
  0xf5   :  { %v189_v45 = vadd.f32 %v188_v43, %v110_v31  ;;  %v494_v46 = vpop.f32.mrb[13].mxu1 }
  0xf6   :  { %v191_v47 = vpop.f32.mrb[14].mxu1 }
  0xf7   :  { %v218_v48 = vadd.f32 %v441_v44, %v189_v45  ;;  %v192_v49 = vadd.f32 %v191_v47, %v113_v33  ;;  %v495_v50 = vpop.f32.mrb[15].mxu1 }
  0xf9   :  { %v224_v51 = vmul.f32 %v218_v48, %v218_v48  ;;  %v219_v52 = vadd.f32 %v441_v44, %v192_v49 }
  0xfb   :  { %v230_v53 = vmul.f32 %v224_v51, %v218_v48  ;;  %v225_v54 = vmul.f32 %v219_v52, %v219_v52 }
  0xfc   :  { %v196_v55 = vpop.f32.mrb[16].mxu1 }
  0xfd   :  { %v236_v56 = vmul.f32 0.044715, %v230_v53  ;;  %v231_v57 = vmul.f32 %v225_v54, %v219_v52  ;;  %v197_v58 = vadd.f32 %v196_v55, %v118_v35  ;;  %v498_v59 = vpop.f32.mrb[17].mxu1 }
  0xfe   :  { %v199_v60 = vpop.f32.mrb[18].mxu1 }
  0xff   :  { %v242_v61 = vadd.f32 %v236_v56, %v218_v48  ;;  %v237_v62 = vmul.f32 0.044715, %v231_v57  ;;  %v220_v63 = vadd.f32 %v441_v44, %v197_v58  ;;  %v200_v0 = vadd.f32 %v199_v60, %v121_v37  ;;  %v499_v2 = vpop.f32.mrb[19].mxu1 }
 0x101   :  { %v248_v3 = vmul.f32 0.7978846, %v242_v61  ;;  %v243_v4 = vadd.f32 %v237_v62, %v219_v52  ;;  %v226_v5 = vmul.f32 %v220_v63, %v220_v63  ;;  %v221_v6 = vadd.f32 %v441_v44, %v200_v0  ;;  %v442_v62 = vld [vmem:[%s762_s6] ss:$0 sm:$0xff]  ;;  %s561_s6 = scalar_lea.vmem %s421_s1, 768 }
 0x102   :  { %p562_p0 = scmp.ne.s32.totalorder %s421_s1, %s561_s6  ;;  %p567_p2 = scmp.lt.s32.totalorder %s561_s6, %s561_s6 }
 0x103   :  { %v249_v7 = vmul.f32 0.7978846, %v243_v4  ;;  %v232_v8 = vmul.f32 %v226_v5, %v220_v63  ;;  %v227_v9 = vmul.f32 %v221_v6, %v221_v6  ;;  %549 = vtanh.f32 %v248_v3 }
 0x104   :  { %v204_v10 = vpop.f32.mrb[20].mxu1  ;;  %p568_p3 = por %p567_p2, %p566_p1 }
 0x105   :  { %v238_v11 = vmul.f32 0.044715, %v232_v8  ;;  %v233_v12 = vmul.f32 %v227_v9, %v221_v6  ;;  %v205_v13 = vadd.f32 %v204_v10, %v126_v39  ;;  %v502_v14 = vpop.f32.mrb[21].mxu1  ;;  %551 = vtanh.f32 %v249_v7 }
 0x106   :  { %v207_v15 = vpop.f32.mrb[22].mxu1  ;;  %p569_p4 = pnand %p568_p3, %p562_p0 }
 0x107   :  { %v244_v16 = vadd.f32 %v238_v11, %v220_v63  ;;  %v239_v17 = vmul.f32 0.044715, %v233_v12  ;;  %v222_v18 = vadd.f32 %v441_v44, %v205_v13  ;;  %v208_v19 = vadd.f32 %v207_v15, %v129_v41  ;;  %v503_v20 = vpop.f32.mrb[23].mxu1 }
 0x109   :  { %v250_v21 = vmul.f32 0.7978846, %v244_v16  ;;  %v245_v22 = vadd.f32 %v239_v17, %v221_v6  ;;  %v228_v23 = vmul.f32 %v222_v18, %v222_v18  ;;  %v223_v24 = vadd.f32 %v441_v44, %v208_v19 }
 0x10b   :  { %v251_v25 = vmul.f32 0.7978846, %v245_v22  ;;  %v234_v26 = vmul.f32 %v228_v23, %v222_v18  ;;  %v229_v27 = vmul.f32 %v223_v24, %v223_v24  ;;  %553 = vtanh.f32 %v250_v21 }
 0x10d   :  { %v550_v28 = vpop.eup %549  ;;  %v240_v29 = vmul.f32 0.044715, %v234_v26  ;;  %v235_v30 = vmul.f32 %v229_v27, %v223_v24  ;;  %555 = vtanh.f32 %v251_v25 }
 0x10e   :  { %v260_v31 = vadd.f32 1.0, %v550_v28 }
 0x10f   :  { %v552_v32 = vpop.eup %551  ;;  %v246_v33 = vadd.f32 %v240_v29, %v222_v18  ;;  %v241_v34 = vmul.f32 0.044715, %v235_v30 }
 0x110   :  { %v261_v35 = vadd.f32 1.0, %v552_v32  ;;  %v266_v36 = vmul.f32 0.5, %v260_v31 }
 0x111   :  { %v252_v37 = vmul.f32 0.7978846, %v246_v33  ;;  %v247_v38 = vadd.f32 %v241_v34, %v223_v24 }
 0x112   :  { %v267_v39 = vmul.f32 0.5, %v261_v35  ;;  %v272_v41 = vmul.f32 %v266_v36, %v218_v48 }
 0x113   :  { %v253_v40 = vmul.f32 0.7978846, %v247_v38  ;;  %557 = vtanh.f32 %v252_v37 }
 0x114   :  { %v273_v42 = vmul.f32 %v267_v39, %v219_v52 }
 0x115   :  { %v554_v43 = vpop.eup %553  ;;  %559 = vtanh.f32 %v253_v40 }
 0x116   :  { %v278_v44 = vpack.c.bf16 %v273_v42, %v272_v41  ;;  %v262_v45 = vadd.f32 1.0, %v554_v43 }
 0x117   :  { %v556_v46 = vpop.eup %555 }
 0x118   :  { %521 = vmatmul.mubr.bf16.vlgmr.msra.gmra.mrb[0].mxu0 %v278_v44  ;;  %v263_v47 = vadd.f32 1.0, %v556_v46  ;;  %v268_v49 = vmul.f32 0.5, %v262_v45 }
 0x119   :  { %524 = vmatprep.mubr.msk.bf16.mxu0 %vm586_vm0, %v585_v1 }
 0x11a   :  { %v269_v50 = vmul.f32 0.5, %v263_v47  ;;  %v274_v51 = vmul.f32 %v268_v49, %v220_v63 }
 0x11c   :  { %v275_v53 = vmul.f32 %v269_v50, %v221_v6 }
 0x11d   :  { %v558_v54 = vpop.eup %557 }
 0x11e   :  { %v279_v55 = vpack.c.bf16 %v275_v53, %v274_v51  ;;  %v264_v56 = vadd.f32 1.0, %v558_v54 }
 0x11f   :  { %v560_v57 = vpop.eup %559 }
 0x120   :  { %525 = vmatmul.mubr.bf16.gmra.mrb[4].mxu0 %v279_v55  ;;  %v265_v48 = vadd.f32 1.0, %v560_v57  ;;  %v270_v52 = vmul.f32 0.5, %v264_v56 }
 0x121   :  { %528 = vmatprep.mubr.msk.bf16.mxu0 %vm586_vm0, %v585_v1 }
 0x122   :  { %v271_v58 = vmul.f32 0.5, %v265_v48  ;;  %v276_v59 = vmul.f32 %v270_v52, %v222_v18 }
 0x124   :  { %v277_v60 = vmul.f32 %v271_v58, %v223_v24 }
 0x126   :  { %v280_v61 = vpack.c.bf16 %v277_v60, %v276_v59 }
 0x128   :  { %529 = vmatmul.mubr.bf16.gmra.mrb[8].mxu0 %v280_v61 }
 0x1eb   :  { %v386_v63 = vpop.f32.mrb[0].mxu0 }
 0x1ec   :  { %v387_v0 = vadd.f32 %v442_v62, %v386_v63  ;;  %v522_v2 = vpop.f32.mrb[1].mxu0 }
 0x1ed   :  { %v389_v3 = vpop.f32.mrb[2].mxu0 }
 0x1ee   :  { %409 = vst [vmem:[#allocation2] sm:$0xff] %v387_v0  ;;  %v390_v4 = vadd.f32 %v442_v62, %v389_v3  ;;  %v523_v5 = vpop.f32.mrb[3].mxu0 }
 0x1f0   :  { %410 = vst [vmem:[#allocation2 + $0x8] sm:$0xff] %v390_v4 }
 0x1f3   :  { %v394_v6 = vpop.f32.mrb[4].mxu0 }
 0x1f4   :  { %v395_v7 = vadd.f32 %v442_v62, %v394_v6  ;;  %v526_v1 = vpop.f32.mrb[5].mxu0 }
 0x1f5   :  { %v397_v8 = vpop.f32.mrb[6].mxu0 }
 0x1f6   :  { %411 = vst [vmem:[#allocation2 + $0x10] sm:$0xff] %v395_v7  ;;  %v398_v9 = vadd.f32 %v442_v62, %v397_v8  ;;  %v527_v10 = vpop.f32.mrb[7].mxu0 }
 0x1f8   :  { %412 = vst [vmem:[#allocation2 + $0x18] sm:$0xff] %v398_v9 }
 0x1fb   :  { %v402_v11 = vpop.f32.mrb[8].mxu0 }
 0x1fc   :  { %v403_v12 = vadd.f32 %v442_v62, %v402_v11  ;;  %v530_v13 = vpop.f32.mrb[9].mxu0 }
 0x1fd   :  { %v405_v14 = vpop.f32.mrb[10].mxu0 }
 0x1fe   :  { %413 = vst [vmem:[#allocation2 + $0x20] sm:$0xff] %v403_v12  ;;  %v406_v15 = vadd.f32 %v442_v62, %v405_v14  ;;  %v531_v16 = vpop.f32.mrb[11].mxu0 }
 0x200   :  { %414 = vst [vmem:[#allocation2 + $0x28] sm:$0xff] %v406_v15 }
 0x201   :  { %572 = shalt.err (!%p569_p4)
}
 0x202   :  { %s573_s25 = scalar_lea.hbm %s763_s7, 768 }
 0x203   :  { %p574_p5 = scmp.ne.s32.totalorder %s763_s7, %s573_s25  ;;  %p577_p6 = scmp.lt.u32.totalorder %s573_s25, %s763_s7 }
 0x205   :  { %p579_p7 = pnand %p577_p6, %p574_p5 }
 0x207   :  { %582 = shalt.err (!%p579_p7)
}
 0x208   :  { %s588_s30 = smov 128   ;;  %s589_s8 = smov 8  }
 0x209   :  { %426 = dma.vmem_to_hbm [thread:$0]  %s421_s1, 768, %s763_s7, [#allocation3], %s588_s30, %s588_s30, %s589_s8  }
 0x20a   :  { %583 = dma.done.wait [#allocation3], 768  }
 0x20b   :  { %584 = vsyncadd [#allocation3], 4294966528 }
 0x20c   :  { %430 = vsyncpa [#allocation3], 1 }

</bundles_post_ra>
